<compile_context>
chip_gen: v6e
topology: v6e:2x2x1
jax: 0.10.0
libtpu: 0.0.40
codegen_flags: <defaults>
</compile_context>

<pallas_src>
import jax
import jax.numpy as jnp
from jax.experimental import pallas as pl
from jax.experimental.pallas import tpu as pltpu


def _attn_body(enc_ref, w_ref, b_ref, out_ref, attw_ref, mask_ref):
    # enc_ref : (Bt, S, D) native dtype (f32 or bf16)
    # w_ref   : (1, 1, D)  f32 attention weight row (nn.Linear(2H, 1).weight)
    # b_ref   : (1,)       f32 bias, SMEM scalar
    # out_ref : (Bt, D)    weighted output (enc dtype)
    # attw_ref: (Bt, S)    attention weights (enc dtype)
    # mask_ref: (Bt, S)    int32, nonzero where the position is masked; or None
    enc = enc_ref[...].astype(jnp.float32)               # f32 math (v5e-safe)
    w = w_ref[...]                                        # (1,1,D), broadcasts implicitly

    # Linear(2H -> 1): VPU multiply + lane (XLU) reduce -> (Bt, S)
    scores = jnp.sum(enc * w, axis=-1) + b_ref[0]
    if mask_ref is not None:
        scores = jnp.where(mask_ref[...] != 0, jnp.float32(-1e9), scores)

    # softmax over the sequence (lane) axis, exact divide.
    m = jnp.max(scores, axis=-1, keepdims=True)           # (Bt, 1)
    e = jnp.exp(scores - m)                                # (Bt, S)
    weights = e / jnp.sum(e, axis=-1, keepdims=True)       # (Bt, S)

    # bmm(weights.unsqueeze(1), enc): VPU multiply + sublane reduce -> (Bt, D)
    weighted = jnp.sum(weights[:, :, None] * enc, axis=1)

    out_ref[...] = weighted.astype(out_ref.dtype)
    attw_ref[...] = weights.astype(attw_ref.dtype)


def _attn_kernel_masked(enc_ref, w_ref, mask_ref, b_ref, out_ref, attw_ref):
    _attn_body(enc_ref, w_ref, b_ref, out_ref, attw_ref, mask_ref)


def _attn_kernel_nomask(enc_ref, w_ref, b_ref, out_ref, attw_ref):
    _attn_body(enc_ref, w_ref, b_ref, out_ref, attw_ref, None)


def _round_up(x, m):
    return ((x + m - 1) // m) * m


def _choose_batch_block(B, S, D, itemsize, target_bytes):
    """Pick a batch tile Bt (a divisor of B) from the padded VMEM footprint."""
    s_pad = _round_up(S, 16)        # sublane tile (covers bf16 packing)
    d_pad = _round_up(D, 128)       # lane tile
    # Per batch row: double-buffered native enc block + the two f32 (Bt,S,D)
    # temporaries the VPU formulation materialises.
    row_bytes = s_pad * d_pad * (2 * itemsize + 2 * 4)
    bt_cap = max(1, target_bytes // row_bytes)

    feasible = [bt for bt in range(1, B + 1)
                if B % bt == 0 and (bt % 8 == 0 or bt == B)]
    within = [bt for bt in feasible if bt <= bt_cap]
    pool = within if within else [min(feasible)]

    def pref(bt):
        steps = B // bt
        multi = (steps >= 2) or (B < 16)      # >=2 steps for v7x's 2 TensorCores
        even = (steps % 2 == 0) or (B < 16)   # even split across the 2 TCs
        return (multi, even, bt)

    return max(pool, key=pref)


def attention_layer(encoder_outputs, weight, bias, mask=None,
                    *, target_block_bytes=8 << 20):
    """Pallas equivalent of AttentionLayer.forward.

    encoder_outputs: (B, S, 2H) float (f32 or bf16; kept in its native dtype)
    weight:          (1, 2H)    nn.Linear(2H, 1).weight
    bias:            (1,)       nn.Linear(2H, 1).bias
    mask:            (B, S) or None; positions where mask == 0 are masked out.
    Returns (weighted_output (B, 2H), attention_weights (B, S)),
    both in encoder_outputs.dtype.
    """
    B, S, D = encoder_outputs.shape
    dtype = encoder_outputs.dtype
    itemsize = jnp.dtype(dtype).itemsize

    w3 = weight.astype(jnp.float32).reshape(1, 1, D)
    b1 = bias.astype(jnp.float32).reshape(1)

    Bt = _choose_batch_block(B, S, D, itemsize, target_block_bytes)
    grid = (B // Bt,)
    # TODO(synk): for extreme S*D where even a Bt=8 block overflows VMEM the S
    # axis would also need tiling with an online softmax; not needed for
    # LSTM-sized inputs.

    # VMEM budget from the real (lane/sublane padded) footprint, kept under
    # v7x's 64 MiB physical VMEM.
    s_pad, d_pad = _round_up(S, 16), _round_up(D, 128)
    enc_block = Bt * s_pad * d_pad * itemsize
    f32_temp = Bt * s_pad * d_pad * 4
    small = 4 * Bt * (_round_up(S, 128) + _round_up(D, 128)) * 4
    vmem_needed = 2 * enc_block + 2 * f32_temp + small
    vmem_limit = int(min(max(32 << 20, vmem_needed + (4 << 20)), 64 << 20))

    compiler_params = pltpu.CompilerParams(
        dimension_semantics=("parallel",),
        vmem_limit_bytes=vmem_limit,
    )
    out_shape = (
        jax.ShapeDtypeStruct((B, D), dtype),
        jax.ShapeDtypeStruct((B, S), dtype),
    )
    out_specs = (
        pl.BlockSpec((Bt, D), lambda i: (i, 0)),
        pl.BlockSpec((Bt, S), lambda i: (i, 0)),
    )
    enc_spec = pl.BlockSpec((Bt, S, D), lambda i: (i, 0, 0))
    w_spec = pl.BlockSpec((1, 1, D), lambda i: (0, 0, 0))
    b_spec = pl.BlockSpec(memory_space=pltpu.MemorySpace.SMEM)

    if mask is None:
        return pl.pallas_call(
            _attn_kernel_nomask,
            grid=grid,
            in_specs=[enc_spec, w_spec, b_spec],
            out_specs=out_specs,
            out_shape=out_shape,
            compiler_params=compiler_params,
        )(encoder_outputs, w3, b1)

    # int32 "is-masked" flags -> exact masked_fill(mask == 0, -1e9) semantics
    # for any mask dtype.
    masked = (mask.reshape(B, S) == 0).astype(jnp.int32)
    return pl.pallas_call(
        _attn_kernel_masked,
        grid=grid,
        in_specs=[enc_spec, w_spec,
                  pl.BlockSpec((Bt, S), lambda i: (i, 0)),
                  b_spec],
        out_specs=out_specs,
        out_shape=out_shape,
        compiler_params=compiler_params,
    )(encoder_outputs, w3, masked, b1)


def _reference(encoder_outputs, weight, bias, mask=None):
    # Pure-JAX reference of the PyTorch forward, for verification (f32 math).
    enc = encoder_outputs.astype(jnp.float32)
    scores = jnp.einsum("bsd,d->bs", enc, weight.reshape(-1).astype(jnp.float32))
    scores = scores + bias.astype(jnp.float32)[0]
    if mask is not None:
        scores = jnp.where(mask == 0, -1e9, scores)
    w = jax.nn.softmax(scores, axis=1)
    out = jnp.einsum("bs,bsd->bd", w, enc)
    return out, w


if __name__ == "__main__":
    hidden_dim = 16
    B, S, D = 16, 16, hidden_dim * 2

    key = jax.random.PRNGKey(0)
    k_enc, k_w, k_b = jax.random.split(key, 3)

    encoder_outputs = jax.random.normal(k_enc, (B, S, D), dtype=jnp.float32)
    # nn.Linear(hidden_dim * 2, 1): weight (1, 2H), bias (1,)
    weight = jax.random.normal(k_w, (1, D), dtype=jnp.float32) * 0.1
    bias = jax.random.normal(k_b, (1,), dtype=jnp.float32) * 0.1
    # Mask out some timesteps of a couple of batch rows.
    mask = jnp.ones((B, S), dtype=jnp.float32)
    mask = mask.at[1, S - 5:].set(0.0)
    mask = mask.at[3, : S // 2].set(0.0)

    # Masked path (f32 enc, exact softmax divide -> tight tolerances).
    out_m, attw_m = attention_layer(encoder_outputs, weight, bias, mask)
    jax.block_until_ready((out_m, attw_m))
    ref_out, ref_w = _reference(encoder_outputs, weight, bias, mask)
    assert out_m.shape == (B, D) and attw_m.shape == (B, S)
    assert jnp.allclose(out_m, ref_out, atol=1e-5, rtol=1e-5)
    assert jnp.allclose(attw_m, ref_w, atol=1e-5, rtol=1e-5)

    # Unmasked path (specialized pallas_call: no mask input at all).
    out_u, attw_u = attention_layer(encoder_outputs, weight, bias, None)
    jax.block_until_ready((out_u, attw_u))
    ref_out_u, ref_w_u = _reference(encoder_outputs, weight, bias, None)
    assert jnp.allclose(out_u, ref_out_u, atol=1e-5, rtol=1e-5)
    assert jnp.allclose(attw_u, ref_w_u, atol=1e-5, rtol=1e-5)

    # Native bf16 path: no wrapper upcast; f32 accumulation happens in-kernel.
    enc_bf16 = encoder_outputs.astype(jnp.bfloat16)
    out_b, attw_b = attention_layer(enc_bf16, weight, bias, mask)
    jax.block_until_ready((out_b, attw_b))
    ref_out_b, ref_w_b = _reference(enc_bf16, weight, bias, mask)
    assert out_b.dtype == jnp.bfloat16 and attw_b.dtype == jnp.bfloat16
    assert jnp.allclose(out_b.astype(jnp.float32), ref_out_b, atol=2e-2, rtol=2e-2)
    assert jnp.allclose(attw_b.astype(jnp.float32), ref_w_b, atol=2e-2, rtol=2e-2)

    print("KERNEL_OK")
</pallas_src>

<mosaic_0001>
module attributes {stable_mosaic.version = 11 : i64} {
  func.func @_attn_kernel_masked(%arg0: i32, %arg1: memref<8x16x32xf32, #tpu.memory_space<vmem>>, %arg2: memref<1x1x32xf32, #tpu.memory_space<vmem>>, %arg3: memref<8x16xi32, #tpu.memory_space<vmem>>, %arg4: memref<1xf32, #tpu.memory_space<smem>>, %arg5: memref<8x32xf32, #tpu.memory_space<vmem>>, %arg6: memref<8x16xf32, #tpu.memory_space<vmem>>) attributes {dimension_semantics = [#tpu.dimension_semantics<parallel>], iteration_bounds = array<i64: 2>, scalar_prefetch = 0 : i64, scratch_operands = 0 : i64, tpu.core_type = #tpu.core_type<tc>, window_params = [{transform_indices = @transform_0, window_bounds = array<i64: 8, 16, 32>}, {pipeline_mode = #tpu.pipeline_mode<synchronous>, transform_indices = @transform_1, window_bounds = array<i64: 1, 1, 32>}, {transform_indices = @transform_2, window_bounds = array<i64: 8, 16>}, {transform_indices = @transform_3, window_bounds = array<i64: 1>}, {transform_indices = @transform_4, window_bounds = array<i64: 8, 32>}, {transform_indices = @transform_5, window_bounds = array<i64: 8, 16>}]} {
    %c0 = arith.constant 0 : index
    %c0_0 = arith.constant 0 : index
    %c0_1 = arith.constant 0 : index
    %0 = vector.load %arg1[%c0, %c0_0, %c0_1] : memref<8x16x32xf32, #tpu.memory_space<vmem>>, vector<8x16x32xf32>
    %c0_2 = arith.constant 0 : index
    %c0_3 = arith.constant 0 : index
    %c0_4 = arith.constant 0 : index
    %1 = vector.load %arg2[%c0_2, %c0_3, %c0_4] : memref<1x1x32xf32, #tpu.memory_space<vmem>>, vector<1x1x32xf32>
    %2 = vector.broadcast %1 : vector<1x1x32xf32> to vector<8x16x32xf32>
    %3 = arith.mulf %0, %2 : vector<8x16x32xf32>
    %cst = arith.constant dense<0.000000e+00> : vector<8x16xf32>
    %4 = vector.multi_reduction <add>, %3, %cst [2] : vector<8x16x32xf32> to vector<8x16xf32>
    %c0_5 = arith.constant 0 : index
    %5 = memref.load %arg4[%c0_5] : memref<1xf32, #tpu.memory_space<smem>>
    %6 = vector.broadcast %5 : f32 to vector<8x16xf32>
    %7 = arith.addf %4, %6 : vector<8x16xf32>
    %c0_6 = arith.constant 0 : index
    %c0_7 = arith.constant 0 : index
    %8 = vector.load %arg3[%c0_6, %c0_7] : memref<8x16xi32, #tpu.memory_space<vmem>>, vector<8x16xi32>
    %c0_i32 = arith.constant 0 : i32
    %9 = vector.broadcast %c0_i32 : i32 to vector<8x16xi32>
    %10 = arith.cmpi ne, %8, %9 : vector<8x16xi32>
    %cst_8 = arith.constant -1.000000e+09 : f32
    %11 = vector.broadcast %cst_8 : f32 to vector<8x16xf32>
    %12 = arith.select %10, %11, %7 : vector<8x16xi1>, vector<8x16xf32>
    %cst_9 = arith.constant dense<0xFF800000> : vector<8xf32>
    %13 = vector.multi_reduction <maximumf>, %12, %cst_9 [1] : vector<8x16xf32> to vector<8xf32>
    %14 = vector.shape_cast %13 : vector<8xf32> to vector<8x1xf32>
    %15 = vector.broadcast %14 : vector<8x1xf32> to vector<8x16xf32>
    %16 = arith.subf %12, %15 : vector<8x16xf32>
    %17 = math.exp %16 : vector<8x16xf32>
    %cst_10 = arith.constant dense<0.000000e+00> : vector<8xf32>
    %18 = vector.multi_reduction <add>, %17, %cst_10 [1] : vector<8x16xf32> to vector<8xf32>
    %19 = vector.shape_cast %18 : vector<8xf32> to vector<8x1xf32>
    %20 = vector.broadcast %19 : vector<8x1xf32> to vector<8x16xf32>
    %21 = arith.divf %17, %20 : vector<8x16xf32>
    %22 = vector.shape_cast %21 : vector<8x16xf32> to vector<8x16x1xf32>
    %23 = vector.broadcast %22 : vector<8x16x1xf32> to vector<8x16x32xf32>
    %24 = arith.mulf %23, %0 : vector<8x16x32xf32>
    %cst_11 = arith.constant dense<0.000000e+00> : vector<8x32xf32>
    %25 = vector.multi_reduction <add>, %24, %cst_11 [1] : vector<8x16x32xf32> to vector<8x32xf32>
    %c0_12 = arith.constant 0 : index
    %c0_13 = arith.constant 0 : index
    %26 = vector.load %arg5[%c0_12, %c0_13] : memref<8x32xf32, #tpu.memory_space<vmem>>, vector<8x32xf32>
    tpu.vector_store %arg5[%c0_12, %c0_13], %25 {strides = array<i32>} : memref<8x32xf32, #tpu.memory_space<vmem>>, vector<8x32xf32>,
    %c0_14 = arith.constant 0 : index
    %c0_15 = arith.constant 0 : index
    %27 = vector.load %arg6[%c0_14, %c0_15] : memref<8x16xf32, #tpu.memory_space<vmem>>, vector<8x16xf32>
    tpu.vector_store %arg6[%c0_14, %c0_15], %21 {strides = array<i32>} : memref<8x16xf32, #tpu.memory_space<vmem>>, vector<8x16xf32>,
    return
  }
  func.func @transform_0(%arg0: i32) -> (i32, i32, i32) {
    %c0_i32 = arith.constant 0 : i32
    %c0_i32_0 = arith.constant 0 : i32
    %c0_i32_1 = arith.constant 0 : i32
    return %arg0, %c0_i32, %c0_i32_0 : i32, i32, i32
  }
  func.func @transform_1(%arg0: i32) -> (i32, i32, i32) {
    %c0_i32 = arith.constant 0 : i32
    %c0_i32_0 = arith.constant 0 : i32
    %c0_i32_1 = arith.constant 0 : i32
    %c0_i32_2 = arith.constant 0 : i32
    return %c0_i32, %c0_i32_0, %c0_i32_1 : i32, i32, i32
  }
  func.func @transform_2(%arg0: i32) -> (i32, i32) {
    %c0_i32 = arith.constant 0 : i32
    %c0_i32_0 = arith.constant 0 : i32
    return %arg0, %c0_i32 : i32, i32
  }
  func.func @transform_3(%arg0: i32) -> i32 {
    %c0_i32 = arith.constant 0 : i32
    %c0_i32_0 = arith.constant 0 : i32
    return %c0_i32 : i32
  }
  func.func @transform_4(%arg0: i32) -> (i32, i32) {
    %c0_i32 = arith.constant 0 : i32
    %c0_i32_0 = arith.constant 0 : i32
    return %arg0, %c0_i32 : i32, i32
  }
  func.func @transform_5(%arg0: i32) -> (i32, i32) {
    %c0_i32 = arith.constant 0 : i32
    %c0_i32_0 = arith.constant 0 : i32
    return %arg0, %c0_i32 : i32, i32
  }
}

</mosaic_0001>

<bundles_post_ra>
// kernel: tpu_custom_call.1
= control target key start
LH: loop header
LB: loop body
LE: loop exit
PB: predicated region body
PF: predicated region fallthrough
CT: control target
= control target key end

     0   :  { %s1536_s0 = inlined_call_operand.hbm [shape: f32[16,16,32], index: 0, kind: input, shape index: {}]   ;;  %s1537_s1 = inlined_call_operand.vmem [shape: f32[1,1,32], index: 1, kind: input, shape index: {}]   ;;  %s1538_s2 = inlined_call_operand.hbm [shape: s32[16,16], index: 2, kind: input, shape index: {}]   ;;  %s1539_s3 = inlined_call_operand.<no memory space> [shape: f32[1], index: 3, kind: input, shape index: {}]   ;;  %s1540_s4 = inlined_call_operand.hbm [shape: f32[16,32], index: 4, kind: output, shape index: {0}]   ;;  %s1541_s5 = inlined_call_operand.hbm [shape: f32[16,16], index: 5, kind: output, shape index: {1}]  }
   0x1   :  { %1544 = sst [smem:[#allocation15_spill]] %s1536_s0 }
   0x2   :  { %11 = sst [smem:[#allocation2]] %s1539_s3 }
   0x3   :  { %12 = vsyncpa [#allocation4], 0 }
   0x4   :  { %14 = vsyncpa [#allocation4 + $0x1], 0 }
   0x5   :  { %15 = vsyncpa [#allocation7], 0 }
   0x6   :  { %17 = vsyncpa [#allocation7 + $0x1], 0 }
   0x7   :  { %18 = vsyncpa [#allocation5], 0 }
   0x8   :  { %20 = vsyncpa [#allocation5 + $0x1], 0 }
   0x9   :  { %21 = vsyncpa [#allocation10], 0 }
   0xa   :  { %23 = vsyncpa [#allocation10 + $0x1], 0  ;;  %s1153_s20 = smov 0   ;;  %s1155_s21 = smov 0  }
   0xb   :  { %s1157_s22 = smov 0   ;;  %s1159_s23 = smov 0  }
   0xc LB: > { %s1174_s3 = sadd.s32 4294967295, %s1112_s23   ;;  %s873_s24 = sadd.s32 4294967294, %s1112_s23   ;;  %s1112_s23 = sphi %s1159_s23, %s1560_s23   ;;  %s1108_s22 = sphi %s1157_s22, %s1559_s22   ;;  %s1104_s21 = sphi %s1155_s21, %s1558_s21   ;;  %s1100_s20 = sphi %s1153_s20, %s1557_s20  }
   0xd   : > { %s1178_s25 = sadd.s32 1, %s1112_s23   ;;  %s36_s26 = sadd.s32 1, %s1108_s22 }
   0xe   : > { %s33_s27 = ssub.s32 %s1112_s23, %s1178_s25  ;;  %p43_p0 = scmp.ne.s32.totalorder %s1108_s22, %s1104_s21 }
   0xf   : > { %p34_p1 = scmp.eq.s32.totalorder %s33_s27, 0  ;;  %p44_p2 = scmp.eq.s32.totalorder %s1112_s23, 0 }
  0x10   : > { %p49_p3 = scmp.ne.s32.totalorder %s1104_s21, %s1100_s20  ;;  %p50_p4 = scmp.eq.s32.totalorder %s1174_s3, 0 }
  0x11   : > { %s1190_s28 = scalar_select %p34_p1, %s1108_s22, %s36_s26  }
  0x12   : > { %p1192_p5 = por %p44_p2, %p43_p0  ;;  %p1196_p6 = por %p50_p4, %p49_p3 }
  0x13   : > { %p141_p7 = scmp.eq.s32.totalorder %s1174_s3, 1  ;;  %p147_p8 = scmp.eq.s32.totalorder %s873_s24, 1 }
  0x14   : > { %s1546_s30 = scalar_select %p1196_p6, 1, 0 }
  0x15   : > { %p918_p10 = scmp.lt.s32.totalorder %s1112_s23, 2  ;;  %p1203_p11 = por %p141_p7, %p43_p0 }
  0x16   : > { %p1207_p12 = por %p147_p8, %p49_p3  ;;  %s1212_s8 = sand.u32 1, %s1108_s22  }
  0x17   : > { %s1547_s6 = scalar_select %p1203_p11, 1, 0 }
  0x18   : > { %s1548_s7 = scalar_select %p1207_p12, 1, 0 }
  0x19   : > { %s895_s9 = sshll.u32 %s1112_s23, 11  ;;  %s876_s10 = sshll.u32 %s1212_s8, 7 }
  0x1a   : > { %s1549_s0 = sld [smem:[#allocation15_spill]]  ;;  %s203_s14 = scalar_lea.vmem [#allocation3], %s876_s10 }
  0x1b   : > { %s211_s15 = sshll.u32 %s203_s14, 4  ;;  %p1223_p13 = pnand %p918_p10, %p1192_p5  ;;  %s1227_s15 = int_to_ptr.vmem [resolvable:$true] %s211_s15 }
  0x1c   : > { %s200_s17 = scalar_lea.sflag [#allocation4], %s1212_s8 }
  0x1d   : > { %p960_p1 = pneg %p1223_p13 }
  0x20   : > { %s1219_s13 = scalar_lea.hbm %s1549_s0, %s895_s9  ;;  %s963_s26 = scalar_lea.hbm %s1549_s0, 4096 }
  0x21   : > { %s958_s18 = scalar_lea.hbm %s1219_s13, 2048  ;;  %p964_p4 = scmp.lt.s32.totalorder %s1219_s13, %s1549_s0 }
  0x22   : > { %p959_p0 = scmp.ne.s32.totalorder %s1219_s13, %s958_s18  ;;  %p965_p5 = scmp.lt.s32.totalorder %s963_s26, %s958_s18 }
  0x24   : > { %p961_p2 = pnand %p960_p1, %p959_p0  ;;  %p966_p7 = por %p965_p5, %p964_p4 }
  0x26   : > { %p962_p3 = pneg %p961_p2 }
  0x28   : > { %p967_p8 = pnand %p966_p7, %p962_p3 }
  0x2a   : > { %970 = shalt.err (!%p967_p8)
}
  0x2b   : > { %s971_s9 = scalar_lea.vmem %s1227_s15, 2048  ;;  %s1114_s10 = smov [#allocation3]  }
  0x2c   : > { %p972_p10 = scmp.ne.s32.totalorder %s1227_s15, %s971_s9  ;;  %s976_s11 = sshll.u32 %s1114_s10, 4  ;;  %s977_s11 = int_to_ptr.vmem [resolvable:$false] %s976_s11 }
  0x2d   : > { %s978_s12 = scalar_lea.vmem %s977_s11, 4096  ;;  %p979_p9 = scmp.lt.s32.totalorder %s1227_s15, %s977_s11 }
  0x2e   : > { %p974_p0 = pnand %p972_p10, %p960_p1  ;;  %p980_p12 = scmp.lt.s32.totalorder %s978_s12, %s971_s9 }
  0x30   : > { %p975_p2 = pneg %p974_p0  ;;  %p981_p11 = por %p980_p12, %p979_p9 }
  0x32   : > { %p982_p4 = pnand %p981_p11, %p975_p2 }
  0x34   : > { %985 = shalt.err (!%p982_p4)
}
  0x35   : > { %s1115_s14 = smov 128   ;;  %s1116_s18 = smov 8  }
  0x36   : > { %907 = dma.hbm_to_vmem [thread:$0]  (!%p1223_p13), %s1219_s13, 2048, %s1227_s15, %s200_s17, %s1115_s14, %s1115_s14, %s1116_s18  }
  0x37   : > { %p882_p3 = scmp.ge.s32.totalorder %s1112_s23, 1  ;;  %p237_p5 = scmp.lt.s32.totalorder %s1112_s23, 3 }
  0x38   : > { %s880_s19 = sshll.u32 %s1212_s8, 3  ;;  %s881_s26 = sshll.u32 %s1112_s23, 7 }
  0x39   : > { %p1259_p9 = pnand %p882_p3, %p237_p5  ;;  %s225_s27 = scalar_lea.vmem [#allocation6], %s880_s19 }
  0x3a   : > { %s232_s29 = sshll.u32 %s225_s27, 4  ;;  %s230_s11 = scalar_lea.hbm %s1538_s2, %s881_s26  ;;  %s233_s29 = int_to_ptr.vmem [resolvable:$true] %s232_s29 }
  0x3b   : > { %s1551_s24 = scalar_select %p1259_p9, 1, 0 }
  0x3c   : > { %s222_s12 = scalar_lea.sflag [#allocation7], %s1212_s8  ;;  %s986_s0 = scalar_lea.hbm %s230_s11, 128 }
  0x3d   : > { %p987_p11 = scmp.ne.s32.totalorder %s230_s11, %s986_s0  ;;  %s991_s17 = scalar_lea.hbm %s1538_s2, 256 }
  0x3e   : > { %p992_p8 = scmp.lt.s32.totalorder %s230_s11, %s1538_s2  ;;  %p993_p10 = scmp.lt.s32.totalorder %s991_s17, %s986_s0 }
  0x3f   : > { %p989_p12 = pnand %p987_p11, %p960_p1 }
  0x40   : > { %p994_p0 = por %p993_p10, %p992_p8 }
  0x41   : > { %p990_p7 = pneg %p989_p12 }
  0x43   : > { %p995_p2 = pnand %p994_p0, %p990_p7 }
  0x45   : > { %998 = shalt.err (!%p995_p2)
}
  0x46   : > { %s999_s19 = scalar_lea.vmem %s233_s29, 128  ;;  %s1117_s8 = smov [#allocation6]  }
  0x47   : > { %p1000_p4 = scmp.ne.s32.totalorder %s233_s29, %s999_s19  ;;  %s1004_s26 = sshll.u32 %s1117_s8, 4  ;;  %s1005_s26 = int_to_ptr.vmem [resolvable:$false] %s1004_s26 }
  0x48   : > { %s1006_s27 = scalar_lea.vmem %s1005_s26, 256  ;;  %p1007_p11 = scmp.lt.s32.totalorder %s233_s29, %s1005_s26 }
  0x49   : > { %p1002_p3 = pnand %p1000_p4, %p960_p1  ;;  %p1008_p12 = scmp.lt.s32.totalorder %s1006_s27, %s999_s19 }
  0x4b   : > { %p1003_p5 = pneg %p1002_p3  ;;  %p1009_p6 = por %p1008_p12, %p1007_p11 }
  0x4d   : > { %p1010_p9 = pnand %p1009_p6, %p1003_p5 }
  0x4f   : > { %1013 = shalt.err (!%p1010_p9)
}
  0x50   : > { %910 = dma.hbm_to_vmem [thread:$0]  (!%p1223_p13), %s230_s11, 128, %s233_s29, %s222_s12  }
  0x51   : > { %p1552_p7 = scmp.ne.s32.totalorder %s1551_s24, 0 }
  0x52   : > { %s1285_s0 = sand.u32 (!%p1552_p7), 1, %s1104_s21   ;;  %p1553_p1 = scmp.ne.s32.totalorder (!%p1552_p7), %s1546_s30, 0 }
  0x53   : > { %241 = sbr.rel (%p1552_p7) target bundleno = 762 (0x2fa), region = 36  ;;  %s883_s9 = sshll.u32 (!%p1552_p7), %s1285_s0, 7 }
  0x54   : > { %s244_s10 = scalar_lea.sflag (!%p1552_p7), [#allocation4], %s1285_s0  ;;  %s1289_s13 = scalar_lea.vmem (!%p1552_p7), [#allocation3], %s883_s9 }
  0x58   : > { %1083 = dma.done.wait (%p1553_p1), %s244_s10, 2048  }
  0x59   : > { %1085 = vsyncadd (%p1553_p1), %s244_s10, 4294965248  ;;  %s1296_s16 = sshll.u32 %s1285_s0, 3  ;;  %s253_s24 = scalar_lea.sflag [#allocation7], %s1285_s0 }
  0x5a   : > { %s256_s29 = scalar_lea.vmem [#allocation6], %s1296_s16 }
  0x5b   : > { %1087 = dma.done.wait (%p1553_p1), %s253_s24, 128  }
  0x5c   : > { %1089 = vsyncadd (%p1553_p1), %s253_s24, 4294967168  ;;  %v1305_v0 = vld [vmem:[%s1289_s13 + $0x10] sm:$0xff]  ;;  %v887_v1 = vld [vmem:[%s1537_s1] ss:$0 sm:$0xff]  ;;  %vm333_vm0 = vcmask 261120   ;;  %v418_v53 = vlaneseq  ;;  %s382_s30 = sld [smem:[#allocation2]] }
  0x5d   : > { %v1311_v2 = vld [vmem:[%s1289_s13] sm:$0xff]  ;;  %v319_v3 = vmul.f32 %v887_v1, %v1305_v0  ;;  %v1316_v5 = vld [vmem:[%s1289_s13 + $0x18] sm:$0xff]  ;;  %v1319_v6 = vld [vmem:[%s1289_s13 + $0x8] sm:$0xff]  ;;  %vm429_vm1 = vcmask 130112   ;;  %vm494_vm2 = vcmask 1041409   ;;  %vm496_vm3 = vcmask 1042434  }
  0x5e   : > { %v317_v4 = vmul.f32 %v887_v1, %v1311_v2  ;;  %v320_v7 = vmul.f32 %v887_v1, %v1316_v5  ;;  %v318_v8 = vmul.f32 %v887_v1, %v1319_v6  ;;  %v1324_v9 = vld [vmem:[%s1289_s13 + $0x28] sm:$0xff]  ;;  %v1327_v10 = vld [vmem:[%s1289_s13 + $0x20] sm:$0xff]  ;;  %v1336_v17 = vld [vmem:[%s1289_s13 + $0x38] sm:$0xff]  ;;  %v419_v56 = vand.u32 127, %v418_v53  ;;  %s292_s15 = scalar_lea.vmem [#allocation9], %s1296_s16  ;;  %s890_s17 = sshll.u32 %s1174_s3, 7 }
  0x5f   : > { %v340_v11 = vsel %vm333_vm0, %v319_v3, 0.0  ;;  %v322_v15 = vmul.f32 %v887_v1, %v1324_v9  ;;  %v321_v16 = vmul.f32 %v887_v1, %v1327_v10  ;;  %v1339_v18 = vld [vmem:[%s1289_s13 + $0x30] sm:$0xff]  ;;  %v324_v21 = vmul.f32 %v887_v1, %v1336_v17  ;;  %v1346_v23 = vld [vmem:[%s1289_s13 + $0x48] sm:$0xff]  ;;  %v1349_v24 = vld [vmem:[%s1289_s13 + $0x40] sm:$0xff]  ;;  %s746_s19 = scalar_lea.hbm %s1541_s5, %s890_s17  ;;  %s748_s8 = sshll.u32 %s292_s15, 4  ;;  %s749_s8 = int_to_ptr.vmem [resolvable:$true] %s748_s8 }
  0x60   : > { %v334_v12 = vsel %vm333_vm0, %v317_v4, 0.0  ;;  %341 = vadd.xlane.f32.xlu1 %v340_v11  ;;  %v343_v13 = vsel %vm333_vm0, %v320_v7, 0.0  ;;  %v337_v14 = vsel %vm333_vm0, %v318_v8, 0.0  ;;  %v323_v22 = vmul.f32 %v887_v1, %v1339_v18  ;;  %v1356_v29 = vld [vmem:[%s1289_s13 + $0x58] sm:$0xff]  ;;  %v1359_v30 = vld [vmem:[%s1289_s13 + $0x50] sm:$0xff]  ;;  %v1366_v35 = vld [vmem:[%s1289_s13 + $0x68] sm:$0xff] }
  0x61   : > { %335 = vadd.xlane.f32.xlu0 %v334_v12  ;;  %v349_v19 = vsel %vm333_vm0, %v322_v15, 0.0  ;;  %v346_v20 = vsel %vm333_vm0, %v321_v16, 0.0  ;;  %v355_v25 = vsel %vm333_vm0, %v324_v21, 0.0  ;;  %v326_v27 = vmul.f32 %v887_v1, %v1346_v23  ;;  %v1369_v36 = vld [vmem:[%s1289_s13 + $0x60] sm:$0xff]  ;;  %v1376_v41 = vld [vmem:[%s1289_s13 + $0x78] sm:$0xff]  ;;  %v1379_v42 = vld [vmem:[%s1289_s13 + $0x70] sm:$0xff] }
  0x62   : > { %v352_v26 = vsel %vm333_vm0, %v323_v22, 0.0  ;;  %v325_v28 = vmul.f32 %v887_v1, %v1349_v24  ;;  %v328_v33 = vmul.f32 %v887_v1, %v1356_v29  ;;  %v327_v34 = vmul.f32 %v887_v1, %v1359_v30  ;;  %s722_s26 = scalar_lea.sflag [#allocation10], %s1285_s0  ;;  %s1014_s27 = scalar_lea.vmem %s749_s8, 128 }
  0x63   : > { %v361_v31 = vsel %vm333_vm0, %v326_v27, 0.0  ;;  %v330_v39 = vmul.f32 %v887_v1, %v1366_v35  ;;  %v329_v40 = vmul.f32 %v887_v1, %v1369_v36  ;;  %v332_v45 = vmul.f32 %v887_v1, %v1376_v41  ;;  %p1015_p6 = scmp.ne.s32.totalorder %s749_s8, %s1014_s27  ;;  %p1554_p13 = scmp.ne.s32.totalorder %s1547_s6, 0 }
  0x64   : > { %344 = vadd.xlane.f32.xlu1 %v343_v13  ;;  %v358_v32 = vsel %vm333_vm0, %v325_v28, 0.0  ;;  %v367_v37 = vsel %vm333_vm0, %v328_v33, 0.0  ;;  %v364_v38 = vsel %vm333_vm0, %v327_v34, 0.0  ;;  %v331_v46 = vmul.f32 %v887_v1, %v1379_v42  ;;  %s1118_s9 = smov [#allocation9]  }
  0x65   : > { %338 = vadd.xlane.f32.xlu0 %v337_v14  ;;  %v373_v43 = vsel %vm333_vm0, %v330_v39, 0.0  ;;  %v370_v44 = vsel %vm333_vm0, %v329_v40, 0.0  ;;  %v379_v47 = vsel %vm333_vm0, %v332_v45, 0.0  ;;  %v424_v57 = vadd.s32 4294967288, %v419_v56  ;;  %p1016_p9 = pnand %p1015_p6, %p1554_p13  ;;  %s1018_s10 = sshll.u32 %s1118_s9, 4  ;;  %s1019_s10 = int_to_ptr.vmem [resolvable:$false] %s1018_s10 }
  0x66   : > { %v376_v48 = vsel %vm333_vm0, %v331_v46, 0.0  ;;  %v1387_v60 = vshrl.u32 %v418_v53, 7  ;;  %v383_v61 = vstv %s382_s30  ;;  %vm498_vm4 = vcmask 1043459   ;;  %s1020_s13 = scalar_lea.vmem %s1019_s10, 256  ;;  %p1021_p10 = scmp.lt.s32.totalorder %s749_s8, %s1019_s10 }
  0x67   : > { %vm500_vm5 = vcmask 1044484   ;;  %vm502_vm6 = vcmask 1045509   ;;  %vm504_vm7 = vcmask 1046534   ;;  %vm506_vm8 = vcmask 1047559   ;;  %p1017_p8 = pneg %p1016_p9  ;;  %p1022_p0 = scmp.lt.s32.totalorder %s1020_s13, %s1014_s27 }
  0x68   : > { %350 = vadd.xlane.f32.xlu1 %v349_v19  ;;  %v1390_v62 = vsub.s32 %v424_v57, %v1387_v60  ;;  %v422_v7 = vsub.s32 %v419_v56, %v1387_v60  ;;  %vm510_vm10 = vcmask 130048  }
  0x69   : > { %347 = vadd.xlane.f32.xlu0 %v346_v20  ;;  %p1023_p2 = por %p1022_p0, %p1021_p10 }
  0x6b   : > { %p1024_p4 = pnand %p1023_p2, %p1017_p8 }
  0x6c   : > { %356 = vadd.xlane.f32.xlu1 %v355_v25 }
  0x6d   : > { %353 = vadd.xlane.f32.xlu0 %v352_v26 }
  0x70   : > { %362 = vadd.xlane.f32.xlu1 %v361_v31 }
  0x71   : > { %359 = vadd.xlane.f32.xlu0 %v358_v32 }
  0x74   : > { %368 = vadd.xlane.f32.xlu1 %v367_v37 }
  0x75   : > { %365 = vadd.xlane.f32.xlu0 %v364_v38 }
  0x78   : > { %374 = vadd.xlane.f32.xlu1 %v373_v43 }
  0x79   : > { %371 = vadd.xlane.f32.xlu0 %v370_v44 }
  0x7c   : > { %380 = vadd.xlane.f32.xlu1 %v379_v47 }
  0x7d   : > { %377 = vadd.xlane.f32.xlu0 %v376_v48 }
  0xe9   : > { %v342_v49 = vpop.xlane.xlu1 %341 }
  0xea   : > { %v336_v50 = vpop.xlane.xlu0 %335  ;;  %v386_v8 = vadd.f32 %v383_v61, %v342_v49 }
  0xeb   : > { %v384_v11 = vadd.f32 %v383_v61, %v336_v50 }
  0xec   : > { %v434_v28 = vrot.slane %v386_v8, %v422_v7 }
  0xed   : > { %v345_v51 = vpop.xlane.xlu1 %344  ;;  %v423_v31 = vrot.slane %v384_v11, %v422_v7 }
  0xee   : > { %v339_v52 = vpop.xlane.xlu0 %338  ;;  %v387_v63 = vadd.f32 %v383_v61, %v345_v51 }
  0xef   : > { %v385_v1 = vadd.f32 %v383_v61, %v339_v52 }
  0xf0   : > { %v438_v16 = vrot.slane %v387_v63, %v1390_v62 }
  0xf1   : > { %v351_v54 = vpop.xlane.xlu1 %350  ;;  %v428_v19 = vrot.slane %v385_v1, %v1390_v62 }
  0xf2   : > { %v348_v55 = vpop.xlane.xlu0 %347  ;;  %v389_v12 = vadd.f32 %v383_v61, %v351_v54  ;;  %v439_v38 = vsel %vm429_vm1, %v438_v16, %v434_v28 }
  0xf3   : > { %v388_v13 = vadd.f32 %v383_v61, %v348_v55  ;;  %v430_v39 = vsel %vm429_vm1, %v428_v19, %v423_v31 }
  0xf4   : > { %v447_v32 = vrot.slane %v389_v12, %v1390_v62  ;;  %v495_v54 = vsel %vm494_vm2, %v439_v38, %v430_v39  ;;  %v557_v39 = vsub.s32 3, %v1387_v60 }
  0xf5   : > { %v357_v58 = vpop.xlane.xlu1 %356  ;;  %v443_v33 = vrot.slane %v388_v13, %v422_v7 }
  0xf6   : > { %v354_v59 = vpop.xlane.xlu0 %353  ;;  %v391_v14 = vadd.f32 %v383_v61, %v357_v58 }
  0xf7   : > { %v390_v15 = vadd.f32 %v383_v61, %v354_v59  ;;  %v448_v50 = vsel %vm429_vm1, %v447_v32, %v443_v33  ;;  %v535_v33 = vsub.s32 1, %v1387_v60 }
  0xf8   : > { %v456_v34 = vrot.slane %v391_v14, %v1390_v62  ;;  %v497_v58 = vsel %vm496_vm3, %v448_v50, %v495_v54 }
  0xf9   : > { %v363_v3 = vpop.xlane.xlu1 %362  ;;  %v452_v37 = vrot.slane %v390_v15, %v422_v7 }
  0xfa   : > { %v360_v4 = vpop.xlane.xlu0 %359  ;;  %v393_v20 = vadd.f32 %v383_v61, %v363_v3  ;;  %v400_v3 = vld [vmem:[%s256_s29] sm:$0xff] }
  0xfb   : > { %v392_v21 = vadd.f32 %v383_v61, %v360_v4  ;;  %v457_v51 = vsel %vm429_vm1, %v456_v34, %v452_v37  ;;  %vm401_vm9 = vcmp.ne.s32.totalorder %v400_v3, 0  ;;  %v546_v34 = vsub.s32 2, %v1387_v60 }
  0xfc   : > { %v465_v40 = vrot.slane %v393_v20, %v1390_v62  ;;  %v499_v4 = vsel %vm498_vm4, %v457_v51, %v497_v58 }
  0xfd   : > { %v369_v22 = vpop.xlane.xlu1 %368  ;;  %v461_v43 = vrot.slane %v392_v21, %v422_v7 }
  0xfe   : > { %v366_v25 = vpop.xlane.xlu0 %365  ;;  %v395_v26 = vadd.f32 %v383_v61, %v369_v22 }
  0xff   : > { %v394_v27 = vadd.f32 %v383_v61, %v366_v25  ;;  %v466_v55 = vsel %vm429_vm1, %v465_v40, %v461_v43  ;;  %v568_v43 = vsub.s32 4, %v1387_v60 }
 0x100   : > { %v474_v46 = vrot.slane %v395_v26, %v1390_v62  ;;  %v501_v13 = vsel %vm500_vm5, %v466_v55, %v499_v4 }
 0x101   : > { %v375_v44 = vpop.xlane.xlu1 %374  ;;  %v470_v47 = vrot.slane %v394_v27, %v422_v7  ;;  %v524_v27 = vsub.s32 0, %v1387_v60 }
 0x102   : > { %v372_v45 = vpop.xlane.xlu0 %371  ;;  %v397_v48 = vadd.f32 %v383_v61, %v375_v44 }
 0x103   : > { %v396_v49 = vadd.f32 %v383_v61, %v372_v45  ;;  %v475_v59 = vsel %vm429_vm1, %v474_v46, %v470_v47  ;;  %v579_v45 = vsub.s32 5, %v1387_v60  ;;  %v590_v47 = vsub.s32 6, %v1387_v60 }
 0x104   : > { %v483_v52 = vrot.slane %v397_v48, %v1390_v62  ;;  %v503_v14 = vsel %vm502_vm6, %v475_v59, %v501_v13 }
 0x105   : > { %v479_v53 = vrot.slane %v396_v49, %v422_v7  ;;  %v381_v56 = vpop.xlane.xlu1 %380  ;;  %v601_v49 = vsub.s32 7, %v1387_v60 }
 0x106   : > { %v378_v57 = vpop.xlane.xlu0 %377  ;;  %v399_v63 = vadd.f32 %v383_v61, %v381_v56 }
 0x107   : > { %v398_v1 = vadd.f32 %v383_v61, %v378_v57  ;;  %v484_v8 = vsel %vm429_vm1, %v483_v52, %v479_v53 }
 0x108   : > { %v492_v11 = vrot.slane %v399_v63, %v1390_v62  ;;  %v505_v61 = vsel %vm504_vm7, %v484_v8, %v503_v14 }
 0x109   : > { %v488_v12 = vrot.slane %v398_v1, %v422_v7 }
 0x10b   : > { %v493_v15 = vsel %vm429_vm1, %v492_v11, %v488_v12 }
 0x10c   : > { %v507_v16 = vsel %vm506_vm8, %v493_v15, %v505_v61 }
 0x10d   : > { %v509_v19 = vsel %vm401_vm9, -1e+09, %v507_v16 }
 0x10e   : > { %v511_v20 = vsel %vm510_vm10, %v509_v19, -inf }
 0x10f   : > { %512 = vmax.xlane.f32.xlu0 %v511_v20 }
 0x198   : > { %v513_v62 = vpop.xlane.xlu0 %512 }
 0x199   : > { %v514_v7 = vsub.f32 %v509_v19, %v513_v62 }
 0x19b   : > { %v515_v21 = vmul.f32 1.442695, %v514_v7 }
 0x19d   : > { %954 = vpow2.f32 %v515_v21 }
 0x1aa   : > { %v955_v22 = vpop.eup %954 }
 0x1ab   : > { %v517_v25 = vsel %vm510_vm10, %v955_v22, 0.0 }
 0x1ac   : > { %518 = vadd.xlane.f32.xlu1 %v517_v25 }
 0x235   : > { %v519_v26 = vpop.xlane.xlu1 %518 }
 0x236   : > { %956 = vrcp.f32 %v519_v26 }
 0x243   : > { %v957_v28 = vpop.eup %956 }
 0x244   : > { %v521_v31 = vmul.f32 %v957_v28, %v955_v22 }
 0x246   : > { %v525_v32 = vrot.slane %v521_v31, %v524_v27  ;;  %715 = vst.msk [vmem:[%s292_s15] sm:$0xff] %vm510_vm10, %v521_v31  ;;  %v536_v37 = vrot.slane %v521_v31, %v535_v33  ;;  %v547_v38 = vrot.slane %v521_v31, %v546_v34  ;;  %v558_v40 = vrot.slane %v521_v31, %v557_v39 }
 0x247   : > { %v569_v44 = vrot.slane %v521_v31, %v568_v43  ;;  %v580_v46 = vrot.slane %v521_v31, %v579_v45  ;;  %v591_v48 = vrot.slane %v521_v31, %v590_v47  ;;  %v602_v50 = vrot.slane %v521_v31, %v601_v49 }
 0x248   : > { %531 = vbcast.lane.b32.xlu1 %v525_v32, 264  ;;  %527 = vbcast.lane.b32.xlu0 %v525_v32, 256 }
 0x24c   : > { %538 = vbcast.lane.b32.xlu1 %v536_v37, 256  ;;  %549 = vbcast.lane.b32.xlu0 %v547_v38, 256 }
 0x250   : > { %542 = vbcast.lane.b32.xlu1 %v536_v37, 264  ;;  %560 = vbcast.lane.b32.xlu0 %v558_v40, 256 }
 0x254   : > { %553 = vbcast.lane.b32.xlu1 %v547_v38, 264  ;;  %571 = vbcast.lane.b32.xlu0 %v569_v44, 256 }
 0x258   : > { %564 = vbcast.lane.b32.xlu1 %v558_v40, 264  ;;  %582 = vbcast.lane.b32.xlu0 %v580_v46, 256 }
 0x25c   : > { %575 = vbcast.lane.b32.xlu1 %v569_v44, 264  ;;  %593 = vbcast.lane.b32.xlu0 %v591_v48, 256 }
 0x260   : > { %586 = vbcast.lane.b32.xlu1 %v580_v46, 264  ;;  %604 = vbcast.lane.b32.xlu0 %v602_v50, 256 }
 0x264   : > { %597 = vbcast.lane.b32.xlu1 %v591_v48, 264 }
 0x268   : > { %608 = vbcast.lane.b32.xlu1 %v602_v50, 264 }
 0x269   : > { %1027 = shalt.err (!%p1024_p4)
}
 0x26a   : > { %s1028_s24 = scalar_lea.hbm %s746_s19, 128  ;;  %s1032_s12 = scalar_lea.hbm %s1541_s5, 256 }
 0x26b   : > { %p1029_p3 = scmp.ne.s32.totalorder %s746_s19, %s1028_s24  ;;  %p1033_p12 = scmp.lt.s32.totalorder %s746_s19, %s1541_s5 }
 0x26c   : > { %p1034_p7 = scmp.lt.s32.totalorder %s1032_s12, %s1028_s24 }
 0x26d   : > { %p1030_p5 = pnand %p1029_p3, %p1554_p13 }
 0x26e   : > { %p1035_p1 = por %p1034_p7, %p1033_p12 }
 0x26f   : > { %p1031_p11 = pneg %p1030_p5 }
 0x271   : > { %p1036_p6 = pnand %p1035_p1, %p1031_p11 }
 0x273   : > { %1039 = shalt.err (!%p1036_p6)
}
 0x274   : > { %901 = dma.vmem_to_hbm [thread:$0]  (%p1554_p13), %s749_s8, 128, %s746_s19, %s722_s26  }
 0x275   : > { %s285_s14 = scalar_lea.vmem [#allocation8], %s1296_s16  ;;  %s1497_s26 = scalar_lea.hbm %s1540_s4, %s890_s17 }
 0x276   : > { %s735_s18 = sshll.u32 %s285_s14, 4  ;;  %s717_s16 = scalar_lea.sflag [#allocation5], %s1285_s0  ;;  %s736_s18 = int_to_ptr.vmem [resolvable:$true] %s735_s18 }
 0x277   : > { %s1040_s27 = scalar_lea.vmem %s736_s18, 128  ;;  %s1119_s9 = smov [#allocation8]  }
 0x278   : > { %p1041_p9 = scmp.ne.s32.totalorder %s736_s18, %s1040_s27  ;;  %s1044_s10 = sshll.u32 %s1119_s9, 4  ;;  %s1045_s10 = int_to_ptr.vmem [resolvable:$false] %s1044_s10 }
 0x279   : > { %s1046_s3 = scalar_lea.vmem %s1045_s10, 256  ;;  %p1047_p0 = scmp.lt.s32.totalorder %s736_s18, %s1045_s10 }
 0x27a   : > { %p1042_p8 = pnand %p1041_p9, %p1554_p13  ;;  %p1048_p2 = scmp.lt.s32.totalorder %s1046_s3, %s1040_s27 }
 0x27c   : > { %p1043_p10 = pneg %p1042_p8  ;;  %p1049_p4 = por %p1048_p2, %p1047_p0 }
 0x27e   : > { %p1050_p3 = pnand %p1049_p4, %p1043_p10 }
 0x2ba   : > { %v532_v60 = vpop.permute.xlu1 %531  ;;  %v528_v51 = vpop.permute.xlu0 %527 }
 0x2bb   : > { %v611_v57 = vmul.f32 %v532_v60, %v1319_v6  ;;  %v610_v58 = vmul.f32 %v528_v51, %v1311_v2 }
 0x2bd   : > { %v627_v11 = vsel %vm333_vm0, %v611_v57, 0.0  ;;  %v626_v12 = vsel %vm333_vm0, %v610_v58, 0.0 }
 0x2be   : > { %v539_v52 = vpop.permute.xlu1 %538  ;;  %v550_v53 = vpop.permute.xlu0 %549  ;;  %v628_v16 = vadd.f32 %v627_v11, %v626_v12 }
 0x2bf   : > { %v612_v59 = vmul.f32 %v539_v52, %v1305_v0  ;;  %v614_v63 = vmul.f32 %v550_v53, %v1327_v10 }
 0x2c0   : > { %v629_v25 = vrot.slane %v628_v16, 4 }
 0x2c1   : > { %v644_v0 = vsel %vm333_vm0, %v614_v63, 0.0 }
 0x2c2   : > { %v543_v54 = vpop.permute.xlu1 %542  ;;  %v561_v55 = vpop.permute.xlu0 %560  ;;  %v630_v38 = vadd.f32 %v629_v25, %v628_v16 }
 0x2c3   : > { %v613_v56 = vmul.f32 %v543_v54, %v1316_v5  ;;  %v635_v5 = vsel %vm333_vm0, %v612_v59, 0.0  ;;  %v616_v6 = vmul.f32 %v561_v55, %v1339_v18 }
 0x2c4   : > { %v631_v60 = vrot.slane %v630_v38, 2 }
 0x2c5   : > { %v636_v4 = vsel %vm333_vm0, %v613_v56, 0.0 }
 0x2c6   : > { %v554_v1 = vpop.permute.xlu1 %553  ;;  %v572_v3 = vpop.permute.xlu0 %571  ;;  %v637_v13 = vadd.f32 %v636_v4, %v635_v5 }
 0x2c7   : > { %v615_v8 = vmul.f32 %v554_v1, %v1324_v9  ;;  %v653_v9 = vsel %vm333_vm0, %v616_v6, 0.0  ;;  %v618_v19 = vmul.f32 %v572_v3, %v1349_v24  ;;  %v632_v1 = vadd.f32 %v631_v60, %v630_v38 }
 0x2c8   : > { %v638_v62 = vrot.slane %v637_v13, 4 }
 0x2c9   : > { %v645_v2 = vsel %vm333_vm0, %v615_v8, 0.0  ;;  %v662_v28 = vsel %vm333_vm0, %v618_v19, 0.0 }
 0x2ca   : > { %v565_v10 = vpop.permute.xlu1 %564  ;;  %v583_v14 = vpop.permute.xlu0 %582  ;;  %v646_v15 = vadd.f32 %v645_v2, %v644_v0  ;;  %v639_v32 = vadd.f32 %v638_v62, %v637_v13  ;;  %v633_v13 = vrot.slane %v632_v1, 1 }
 0x2cb   : > { %v617_v61 = vmul.f32 %v565_v10, %v1336_v17  ;;  %v620_v17 = vmul.f32 %v583_v14, %v1359_v30 }
 0x2cc   : > { %v647_v21 = vrot.slane %v646_v15, 4  ;;  %v640_v45 = vrot.slane %v639_v32, 2  ;;  %v634_v62 = vadd.f32 %v633_v13, %v632_v1 }
 0x2cd   : > { %v654_v20 = vsel %vm333_vm0, %v617_v61, 0.0 }
 0x2ce   : > { %v655_v7 = vadd.f32 %v654_v20, %v653_v9  ;;  %v576_v18 = vpop.permute.xlu1 %575  ;;  %v594_v27 = vpop.permute.xlu0 %593  ;;  %v648_v34 = vadd.f32 %v647_v21, %v646_v15  ;;  %v641_v55 = vadd.f32 %v640_v45, %v639_v32 }
 0x2cf   : > { %v619_v22 = vmul.f32 %v576_v18, %v1346_v23  ;;  %v671_v23 = vsel %vm333_vm0, %v620_v17, 0.0  ;;  %v622_v43 = vmul.f32 %v594_v27, %v1369_v36 }
 0x2d0   : > { %v656_v26 = vrot.slane %v655_v7, 4  ;;  %v649_v49 = vrot.slane %v648_v34, 2  ;;  %v642_v5 = vrot.slane %v641_v55, 1 }
 0x2d1   : > { %v663_v31 = vsel %vm333_vm0, %v619_v22, 0.0  ;;  %v680_v53 = vsel %vm333_vm0, %v622_v43, 0.0 }
 0x2d2   : > { %v664_v33 = vadd.f32 %v663_v31, %v662_v28  ;;  %v587_v24 = vpop.permute.xlu1 %586  ;;  %v657_v39 = vadd.f32 %v656_v26, %v655_v7  ;;  %v605_v47 = vpop.permute.xlu0 %604  ;;  %v650_v59 = vadd.f32 %v649_v49, %v648_v34 }
 0x2d3   : > { %v621_v37 = vmul.f32 %v587_v24, %v1356_v29  ;;  %v624_v54 = vmul.f32 %v605_v47, %v1379_v42 }
 0x2d4   : > { %v665_v40 = vrot.slane %v664_v33, 4  ;;  %v658_v51 = vrot.slane %v657_v39, 2  ;;  %v651_v0 = vrot.slane %v650_v59, 1 }
 0x2d5   : > { %v672_v44 = vsel %vm333_vm0, %v621_v37, 0.0  ;;  %v689_v11 = vsel %vm333_vm0, %v624_v54, 0.0 }
 0x2d6   : > { %v666_v46 = vadd.f32 %v665_v40, %v664_v33  ;;  %v673_v30 = vadd.f32 %v672_v44, %v671_v23  ;;  %v598_v48 = vpop.permute.xlu1 %597  ;;  %v659_v3 = vadd.f32 %v658_v51, %v657_v39  ;;  %v652_v20 = vadd.f32 %v651_v0, %v650_v59 }
 0x2d7   : > { %v623_v50 = vmul.f32 %v598_v48, %v1366_v35 }
 0x2d8   : > { %v674_v29 = vrot.slane %v673_v30, 4  ;;  %v667_v52 = vrot.slane %v666_v46, 2  ;;  %v660_v10 = vrot.slane %v659_v3, 1 }
 0x2d9   : > { %v681_v36 = vsel %vm333_vm0, %v623_v50, 0.0 }
 0x2da   : > { %v675_v56 = vadd.f32 %v674_v29, %v673_v30  ;;  %v682_v57 = vadd.f32 %v681_v36, %v680_v53  ;;  %v609_v58 = vpop.permute.xlu1 %608  ;;  %v668_v8 = vadd.f32 %v667_v52, %v666_v46  ;;  %v661_v7 = vadd.f32 %v660_v10, %v659_v3 }
 0x2db   : > { %v625_v63 = vmul.f32 %v609_v58, %v1376_v41  ;;  %v643_v41 = vadd.f32 %v642_v5, %v641_v55 }
 0x2dc   : > { %v676_v35 = vrot.slane %v675_v56, 2  ;;  %v683_v4 = vrot.slane %v682_v57, 4  ;;  %v669_v61 = vrot.slane %v668_v8, 1 }
 0x2dd   : > { %v690_v12 = vsel %vm333_vm0, %v625_v63, 0.0  ;;  %v706_v25 = vsel %vm494_vm2, %v643_v41, %v634_v62 }
 0x2de   : > { %v677_v42 = vadd.f32 %v676_v35, %v675_v56  ;;  %v684_v6 = vadd.f32 %v683_v4, %v682_v57  ;;  %v691_v2 = vadd.f32 %v690_v12, %v689_v11  ;;  %v670_v22 = vadd.f32 %v669_v61, %v668_v8 }
 0x2df   : > { %v707_v28 = vsel %vm496_vm3, %v652_v20, %v706_v25 }
 0x2e0   : > { %v685_v14 = vrot.slane %v684_v6, 2  ;;  %v692_v15 = vrot.slane %v691_v2, 4  ;;  %v678_v16 = vrot.slane %v677_v42, 1  ;;  %v708_v31 = vsel %vm498_vm4, %v661_v7, %v707_v28 }
 0x2e1   : > { %v709_v33 = vsel %vm500_vm5, %v670_v22, %v708_v31 }
 0x2e2   : > { %v686_v9 = vadd.f32 %v685_v14, %v684_v6  ;;  %v693_v19 = vadd.f32 %v692_v15, %v691_v2  ;;  %v679_v26 = vadd.f32 %v678_v16, %v677_v42 }
 0x2e4   : > { %v687_v18 = vrot.slane %v686_v9, 1  ;;  %v694_v21 = vrot.slane %v693_v19, 2  ;;  %v710_v24 = vsel %vm502_vm6, %v679_v26, %v709_v33 }
 0x2e6   : > { %v695_v27 = vadd.f32 %v694_v21, %v693_v19  ;;  %v688_v17 = vadd.f32 %v687_v18, %v686_v9 }
 0x2e8   : > { %v696_v32 = vrot.slane %v695_v27, 1  ;;  %v711_v37 = vsel %vm504_vm7, %v688_v17, %v710_v24 }
 0x2ea   : > { %v697_v34 = vadd.f32 %v696_v32, %v695_v27 }
 0x2ec   : > { %v712_v38 = vsel %vm506_vm8, %v697_v34, %v711_v37 }
 0x2ed   : > { %714 = vst.msk [vmem:[%s285_s14] sm:$0xff] %vm333_vm0, %v712_v38 }
 0x2ee   : > { %1053 = shalt.err (!%p1050_p3)
}
 0x2ef   : > { %s1054_s17 = scalar_lea.hbm %s1497_s26, 128  ;;  %s1058_s24 = scalar_lea.hbm %s1540_s4, 256 }
 0x2f0   : > { %p1055_p5 = scmp.ne.s32.totalorder %s1497_s26, %s1054_s17  ;;  %p1059_p7 = scmp.lt.s32.totalorder %s1497_s26, %s1540_s4 }
 0x2f1   : > { %p1060_p1 = scmp.lt.s32.totalorder %s1058_s24, %s1054_s17 }
 0x2f2   : > { %p1056_p11 = pnand %p1055_p5, %p1554_p13 }
 0x2f3   : > { %p1061_p6 = por %p1060_p1, %p1059_p7 }
 0x2f4   : > { %p1057_p12 = pneg %p1056_p11 }
 0x2f6   : > { %p1062_p9 = pnand %p1061_p6, %p1057_p12 }
 0x2f8   : > { %1065 = shalt.err (!%p1062_p9)
}
 0x2f9   : > { %900 = dma.vmem_to_hbm [thread:$0]  (%p1554_p13), %s736_s18, 128, %s1497_s26, %s717_s16  }
 0x2fa PF: > { %s760_s12 = sand.u32 1, %s1100_s20   ;;  %p1555_p8 = scmp.ne.s32.totalorder %s1548_s7, 0 }
 0x2fb   : > { %p1556_p10 = scmp.ge.s32.totalorder %s1112_s23, 2  ;;  %s761_s30 = scalar_lea.sflag [#allocation5], %s760_s12 }
 0x2fd   : > { %p912_p0 = pnand %p1556_p10, %p1555_p8 }
 0x2ff   : > { %p913_p2 = pneg %p912_p0 }
 0x301   : > { %1091 = dma.done.wait (%p913_p2), %s761_s30, 128  }
 0x302   : > { %1093 = vsyncadd (%p913_p2), %s761_s30, 4294967168  ;;  %s770_s15 = scalar_lea.sflag [#allocation10], %s760_s12 }
 0x303   : > { %1095 = dma.done.wait (%p913_p2), %s770_s15, 128  }
 0x304   : > { %1097 = vsyncadd (%p913_p2), %s770_s15, 4294967168  ;;  %p26_p13 = scmp.ge.s32.totalorder %s1178_s25, 4   ;;  %s1557_s20 = smov %s1104_s21 }
 0x305   : > { %s1558_s21 = smov %s1108_s22  ;;  %s1559_s22 = smov %s1190_s28 }
 0x306   : > { %s1560_s23 = smov %s1178_s25  ;;  %28 = sbr.rel (!%p26_p13) target bundleno = 12 (0xc), region = 111 }
 0x30b   :  { %775 = vsyncpa [#allocation4], 1 }
 0x30c   :  { %777 = vsyncpa [#allocation4 + $0x1], 1 }
 0x30d   :  { %778 = vsyncpa [#allocation7], 1 }
 0x30e   :  { %780 = vsyncpa [#allocation7 + $0x1], 1 }
 0x30f   :  { %781 = vsyncpa [#allocation5], 1 }
 0x310   :  { %783 = vsyncpa [#allocation5 + $0x1], 1 }
 0x311   :  { %784 = vsyncpa [#allocation10], 1 }
 0x312   :  { %786 = vsyncpa [#allocation10 + $0x1], 1 }

</bundles_post_ra>
